<compile_context>
chip_gen: v5e
topology: v5e:2x2
jax: 0.10.0
libtpu: 0.0.40
codegen_flags: <defaults>
</compile_context>

<pallas_src>
import jax
import jax.numpy as jnp
from jax import lax
from jax.experimental import pallas as pl
from jax.experimental.pallas import tpu as pltpu

KH = KW = 5
PAD = 2
CIN = 3
COUT = 32
K = KH * KW * CIN  # 75


def conv_relu_pool_kernel(p_ref, w_ref, b_ref, o_ref):
    # p_ref: (4, tm, K) bf16 -- group g holds pool sub-position (dy, dx) = (g//2, g%2)
    # w_ref: (K, COUT) bf16;  b_ref: (1, COUT) f32;  o_ref: (tm, COUT) f32
    w = w_ref[...]
    acc = jnp.dot(p_ref[0], w, preferred_element_type=jnp.float32)
    for g in range(1, 4):  # static unroll: 4 MXU dots with a running max (2x2 pool)
        acc = jnp.maximum(acc, jnp.dot(p_ref[g], w, preferred_element_type=jnp.float32))
    # bias + ReLU AFTER the pool max: relu(max_i(x_i) + b) == max_i(relu(x_i + b))
    o_ref[...] = jnp.maximum(acc + b_ref[...], 0.0).astype(o_ref.dtype)


def _round_up(a, b):
    return (a + b - 1) // b * b


def _pick_tile(m, tile_m):
    """Tile over pool-output rows: multiple of 8, <= tile_m, >= 2 tiles when
    possible (keeps both v7x TensorCores busy), preferring exact divisors of m
    so no pad copy of the patch tensor is needed."""
    cap = min(tile_m, max(8, _round_up((m + 1) // 2, 8)))
    cap -= cap % 8
    cap = max(cap, 8)
    t = cap
    while t >= 8 and cap - t < 512:       # bounded scan for an exact divisor
        if m % t == 0:
            return t
        t -= 8
    return cap                             # fall back to padding m up to cap


def _im2col_pool_patches(x_nchw, hp, wp):
    """(N,3,H,W) f32 -> (4, N*hp*wp, K) bf16.

    Group order (dy,dx) = (0,0),(0,1),(1,0),(1,1); columns ordered (kh,kw,ci)
    to match the weight reshape. Each group is built directly with stride-2
    slices of the padded input, so the 25x patch tensor is materialized once.
    """
    n = x_nchw.shape[0]
    x_nhwc = jnp.transpose(x_nchw, (0, 2, 3, 1)).astype(jnp.bfloat16)
    x_pad = jnp.pad(x_nhwc, ((0, 0), (PAD, PAD), (PAD, PAD), (0, 0)))  # (N, H+4, W+4, 3)
    m = n * hp * wp
    groups = []
    for dy in (0, 1):
        for dx in (0, 1):
            cols = []
            for kh in range(KH):
                for kw in range(KW):
                    # stride-2 slice: rows 2*r + dy + kh, cols 2*c + dx + kw
                    sl = lax.slice(
                        x_pad,
                        (0, dy + kh, dx + kw, 0),
                        (n, dy + kh + 2 * (hp - 1) + 1, dx + kw + 2 * (wp - 1) + 1, CIN),
                        (1, 2, 2, 1))                                  # (N, hp, wp, 3)
                    cols.append(sl)
            g = jnp.stack(cols, axis=3)                                # (N, hp, wp, 25, 3)
            groups.append(g.reshape(m, K))
    return jnp.stack(groups, axis=0)                                   # (4, M, K)


def model_forward(x_nchw, weight, bias, *, tile_m=2048):
    """x: (N,3,H,W) f32; weight: (32,3,5,5) f32; bias: (32,) f32 -> (N,32,H/2,W/2) f32."""
    n, cin, h, w = x_nchw.shape
    assert cin == CIN and h % 2 == 0 and w % 2 == 0
    hp, wp = h // 2, w // 2
    m = n * hp * wp

    tm = _pick_tile(m, tile_m)
    m_pad = _round_up(m, tm)
    n_tiles = m_pad // tm

    patches = _im2col_pool_patches(x_nchw, hp, wp)                     # (4, m, K) bf16
    if m_pad != m:
        patches = jnp.pad(patches, ((0, 0), (0, m_pad - m), (0, 0)))   # rare: tail pad

    w_mat = jnp.transpose(weight, (2, 3, 1, 0)).reshape(K, COUT).astype(jnp.bfloat16)
    b_mat = bias.reshape(1, COUT).astype(jnp.float32)

    cost = pl.CostEstimate(
        flops=2 * 4 * m_pad * K * COUT,
        transcendentals=0,
        bytes_accessed=4 * m_pad * K * 2 + K * COUT * 2 + COUT * 4 + m_pad * COUT * 4,
    )

    out_flat = pl.pallas_call(
        conv_relu_pool_kernel,
        out_shape=jax.ShapeDtypeStruct((m_pad, COUT), jnp.float32),
        grid_spec=pltpu.PrefetchScalarGridSpec(
            num_scalar_prefetch=0,
            grid=(n_tiles,),
            in_specs=[pl.BlockSpec((4, tm, K), lambda i: (0, i, 0)),   # 4 groups, same row tile
                      pl.BlockSpec((K, COUT), lambda i: (0, 0)),
                      pl.BlockSpec((1, COUT), lambda i: (0, 0))],
            out_specs=pl.BlockSpec((tm, COUT), lambda i: (i, 0)),
        ),
        compiler_params=pltpu.CompilerParams(
            dimension_semantics=("parallel",),
            vmem_limit_bytes=32 * 1024 * 1024),
        cost_estimate=cost,
    )(patches, w_mat, b_mat)

    # Padded tail rows (if any) hold relu(bias) garbage; sliced off here.
    out = out_flat[:m].reshape(n, hp, wp, COUT)
    return jnp.transpose(out, (0, 3, 1, 2))                            # (N, 32, H/2, W/2)


def reference_forward(x_nchw, weight, bias):
    y = lax.conv_general_dilated(
        x_nchw, weight, window_strides=(1, 1),
        padding=((PAD, PAD), (PAD, PAD)),
        dimension_numbers=("NCHW", "OIHW", "NCHW"))
    y = y + bias.reshape(1, COUT, 1, 1)
    y = jnp.maximum(y, 0.0)
    y = lax.reduce_window(y, -jnp.inf, lax.max,
                          (1, 1, 2, 2), (1, 1, 2, 2), "VALID")
    return y


if __name__ == "__main__":
    key = jax.random.PRNGKey(0)
    kx, kw_, kb = jax.random.split(key, 3)
    # Small shapes consistent with the module: N=2, Cin=3, 16x16 images.
    x = jax.random.normal(kx, (2, CIN, 16, 16), dtype=jnp.float32)
    weight = jax.random.normal(kw_, (COUT, CIN, KH, KW), dtype=jnp.float32) * 0.1
    bias = jax.random.normal(kb, (COUT,), dtype=jnp.float32) * 0.01

    fwd = jax.jit(model_forward)
    out = fwd(x, weight, bias)
    jax.block_until_ready(out)

    ref = reference_forward(x, weight, bias)
    assert out.shape == (2, COUT, 8, 8), out.shape
    err = float(jnp.max(jnp.abs(out - ref)))
    # bf16 patch/weight quantization vs the f32 reference -> loosened tolerance.
    assert err < 5e-2, err
    print("KERNEL_OK")
</pallas_src>

<mosaic_0001>
module attributes {stable_mosaic.version = 11 : i64} {
  func.func @conv_relu_pool_kernel(%arg0: i32, %arg1: memref<4x64x75xbf16, #tpu.memory_space<vmem>>, %arg2: memref<75x32xbf16, #tpu.memory_space<vmem>>, %arg3: memref<1x32xf32, #tpu.memory_space<vmem>>, %arg4: memref<64x32xf32, #tpu.memory_space<vmem>>) attributes {dimension_semantics = [#tpu.dimension_semantics<parallel>], iteration_bounds = array<i64: 2>, scalar_prefetch = 0 : i64, scratch_operands = 0 : i64, tpu.core_type = #tpu.core_type<tc>, window_params = [{transform_indices = @transform_0, window_bounds = array<i64: 4, 64, 75>}, {pipeline_mode = #tpu.pipeline_mode<synchronous>, transform_indices = @transform_1, window_bounds = array<i64: 75, 32>}, {pipeline_mode = #tpu.pipeline_mode<synchronous>, transform_indices = @transform_2, window_bounds = array<i64: 1, 32>}, {transform_indices = @transform_3, window_bounds = array<i64: 64, 32>}]} {
    %c0 = arith.constant 0 : index
    %c0_0 = arith.constant 0 : index
    %0 = vector.load %arg2[%c0, %c0_0] : memref<75x32xbf16, #tpu.memory_space<vmem>>, vector<75x32xbf16>
    %c0_1 = arith.constant 0 : index
    %c0_2 = arith.constant 0 : index
    %c0_3 = arith.constant 0 : index
    %1 = vector.load %arg1[%c0_1, %c0_2, %c0_3] : memref<4x64x75xbf16, #tpu.memory_space<vmem>>, vector<1x64x75xbf16>
    %2 = vector.shape_cast %1 : vector<1x64x75xbf16> to vector<64x75xbf16>
    %cst = arith.constant dense<0.000000e+00> : vector<64x32xf32>
    %3 = tpu.matmul %2, %0, %cst {dimension_numbers = #tpu.dot_dimension_numbers<[1], [0], [0], [1], [0, 0, 1, 1], [], []>} : vector<64x75xbf16>, vector<75x32xbf16>, vector<64x32xf32> -> vector<64x32xf32>
    %c1 = arith.constant 1 : index
    %c0_4 = arith.constant 0 : index
    %c0_5 = arith.constant 0 : index
    %4 = vector.load %arg1[%c1, %c0_4, %c0_5] : memref<4x64x75xbf16, #tpu.memory_space<vmem>>, vector<1x64x75xbf16>
    %5 = vector.shape_cast %4 : vector<1x64x75xbf16> to vector<64x75xbf16>
    %cst_6 = arith.constant dense<0.000000e+00> : vector<64x32xf32>
    %6 = tpu.matmul %5, %0, %cst_6 {dimension_numbers = #tpu.dot_dimension_numbers<[1], [0], [0], [1], [0, 0, 1, 1], [], []>} : vector<64x75xbf16>, vector<75x32xbf16>, vector<64x32xf32> -> vector<64x32xf32>
    %7 = arith.maximumf %3, %6 : vector<64x32xf32>
    %c2 = arith.constant 2 : index
    %c0_7 = arith.constant 0 : index
    %c0_8 = arith.constant 0 : index
    %8 = vector.load %arg1[%c2, %c0_7, %c0_8] : memref<4x64x75xbf16, #tpu.memory_space<vmem>>, vector<1x64x75xbf16>
    %9 = vector.shape_cast %8 : vector<1x64x75xbf16> to vector<64x75xbf16>
    %cst_9 = arith.constant dense<0.000000e+00> : vector<64x32xf32>
    %10 = tpu.matmul %9, %0, %cst_9 {dimension_numbers = #tpu.dot_dimension_numbers<[1], [0], [0], [1], [0, 0, 1, 1], [], []>} : vector<64x75xbf16>, vector<75x32xbf16>, vector<64x32xf32> -> vector<64x32xf32>
    %11 = arith.maximumf %7, %10 : vector<64x32xf32>
    %c3 = arith.constant 3 : index
    %c0_10 = arith.constant 0 : index
    %c0_11 = arith.constant 0 : index
    %12 = vector.load %arg1[%c3, %c0_10, %c0_11] : memref<4x64x75xbf16, #tpu.memory_space<vmem>>, vector<1x64x75xbf16>
    %13 = vector.shape_cast %12 : vector<1x64x75xbf16> to vector<64x75xbf16>
    %cst_12 = arith.constant dense<0.000000e+00> : vector<64x32xf32>
    %14 = tpu.matmul %13, %0, %cst_12 {dimension_numbers = #tpu.dot_dimension_numbers<[1], [0], [0], [1], [0, 0, 1, 1], [], []>} : vector<64x75xbf16>, vector<75x32xbf16>, vector<64x32xf32> -> vector<64x32xf32>
    %15 = arith.maximumf %11, %14 : vector<64x32xf32>
    %c0_13 = arith.constant 0 : index
    %c0_14 = arith.constant 0 : index
    %16 = vector.load %arg3[%c0_13, %c0_14] : memref<1x32xf32, #tpu.memory_space<vmem>>, vector<1x32xf32>
    %17 = vector.broadcast %16 : vector<1x32xf32> to vector<64x32xf32>
    %18 = arith.addf %15, %17 : vector<64x32xf32>
    %cst_15 = arith.constant 0.000000e+00 : f32
    %19 = vector.broadcast %cst_15 : f32 to vector<64x32xf32>
    %20 = arith.maximumf %18, %19 : vector<64x32xf32>
    %c0_16 = arith.constant 0 : index
    %c0_17 = arith.constant 0 : index
    %21 = vector.load %arg4[%c0_16, %c0_17] : memref<64x32xf32, #tpu.memory_space<vmem>>, vector<64x32xf32>
    tpu.vector_store %arg4[%c0_16, %c0_17], %20 {strides = array<i32>} : memref<64x32xf32, #tpu.memory_space<vmem>>, vector<64x32xf32>,
    return
  }
  func.func @transform_0(%arg0: i32) -> (i32, i32, i32) {
    %c0_i32 = arith.constant 0 : i32
    %c0_i32_0 = arith.constant 0 : i32
    %c0_i32_1 = arith.constant 0 : i32
    return %c0_i32, %arg0, %c0_i32_0 : i32, i32, i32
  }
  func.func @transform_1(%arg0: i32) -> (i32, i32) {
    %c0_i32 = arith.constant 0 : i32
    %c0_i32_0 = arith.constant 0 : i32
    %c0_i32_1 = arith.constant 0 : i32
    return %c0_i32, %c0_i32_0 : i32, i32
  }
  func.func @transform_2(%arg0: i32) -> (i32, i32) {
    %c0_i32 = arith.constant 0 : i32
    %c0_i32_0 = arith.constant 0 : i32
    %c0_i32_1 = arith.constant 0 : i32
    return %c0_i32, %c0_i32_0 : i32, i32
  }
  func.func @transform_3(%arg0: i32) -> (i32, i32) {
    %c0_i32 = arith.constant 0 : i32
    %c0_i32_0 = arith.constant 0 : i32
    return %arg0, %c0_i32 : i32, i32
  }
}

</mosaic_0001>

<bundles_post_ra>
// kernel: model_forward.1
= control target key start
LH: loop header
LB: loop body
LE: loop exit
PB: predicated region body
PF: predicated region fallthrough
CT: control target
= control target key end

     0   :  { %8 = vsyncpa [#allocation4], 0  ;;  %s1291_s0 = inlined_call_operand.vmem [shape: bf16[4,128,75], index: 0, kind: input, shape index: {}]   ;;  %s1292_s1 = inlined_call_operand.vmem [shape: bf16[75,32], index: 1, kind: input, shape index: {}]   ;;  %s1293_s2 = inlined_call_operand.vmem [shape: f32[1,32], index: 2, kind: input, shape index: {}]   ;;  %s1294_s3 = inlined_call_operand.hbm [shape: f32[128,32], index: 3, kind: output, shape index: {}]  }
   0x1   :  { %10 = vsyncpa [#allocation4 + $0x1], 0  ;;  %s1094_s12 = smov 0   ;;  %s1096_s13 = smov 0  }
   0x2   :  { %s1098_s14 = smov 0   ;;  %s1100_s15 = smov 0  }
   0x3 LB: > { %s802_s16 = sadd.s32 4294967295, %s1069_s15   ;;  %s803_s17 = sadd.s32 4294967294, %s1069_s15   ;;  %s1069_s15 = sphi %s1100_s15, %s1300_s15   ;;  %s1065_s14 = sphi %s1098_s14, %s1299_s14   ;;  %s1061_s13 = sphi %s1096_s13, %s1298_s13   ;;  %s1057_s12 = sphi %s1094_s12, %s1297_s12  }
   0x4   : > { %s1117_s18 = sadd.s32 1, %s1069_s15   ;;  %s23_s19 = sadd.s32 1, %s1065_s14 }
   0x5   : > { %s20_s20 = ssub.s32 %s1069_s15, %s1117_s18  ;;  %p30_p0 = scmp.ne.s32.totalorder %s1065_s14, %s1061_s13 }
   0x6   : > { %p21_p1 = scmp.eq.s32.totalorder %s20_s20, 0  ;;  %p31_p2 = scmp.eq.s32.totalorder %s1069_s15, 0 }
   0x7   : > { %p102_p3 = scmp.eq.s32.totalorder %s802_s16, 1  ;;  %p107_p4 = scmp.ne.s32.totalorder %s1061_s13, %s1057_s12 }
   0x8   : > { %s1130_s21 = scalar_select %p21_p1, %s1065_s14, %s23_s19  }
   0x9   : > { %p32_p5 = por %p31_p2, %p30_p0  ;;  %p1132_p6 = por %p102_p3, %p30_p0 }
   0xa   : > { %p108_p7 = scmp.eq.s32.totalorder %s803_s17, 1  ;;  %p805_p9 = scmp.ge.s32.totalorder %s1069_s15, 2 }
   0xc   : > { %p1136_p8 = por %p108_p7, %p107_p4  ;;  %130 = sbr.rel (%p805_p9) target bundleno = 37 (0x25), region = 24 }
  0x11   : > { %133 = sbr.rel (!%p32_p5) target bundleno = 37 (0x25), region = 28  ;;  %s135_s24 = sand.u32 (%p32_p5), 1, %s1065_s14  }
  0x12   : > { %s941_s25 = sshll.u32 (%p32_p5), %s1069_s15, 5  ;;  %s806_s26 = sshll.u32 (%p32_p5), %s135_s24, 7 }
  0x13   : > { %s1148_s29 = scalar_lea.vmem (%p32_p5), %s1291_s0, %s941_s25  ;;  %s137_s30 = scalar_lea.vmem (%p32_p5), [#allocation2], %s806_s26 }
  0x14   : > { %v157_v0 = vld [vmem:[%s1148_s29] sm:$0xff] (%p32_p5)   ;;  %v161_v1 = vld [vmem:[%s1148_s29 + $0x8] sm:$0xff] (%p32_p5)   ;;  %v165_v2 = vld [vmem:[%s1148_s29 + $0x10] sm:$0xff] (%p32_p5)  }
  0x15   : > { %158 = vst [vmem:[%s137_s30] sm:$0xff] (%p32_p5), %v157_v0   ;;  %v169_v3 = vld [vmem:[%s1148_s29 + $0x18] sm:$0xff] (%p32_p5)   ;;  %v173_v4 = vld [vmem:[%s1148_s29 + $0x40] sm:$0xff] (%p32_p5)   ;;  %v177_v5 = vld [vmem:[%s1148_s29 + $0x48] sm:$0xff] (%p32_p5)  }
  0x16   : > { %162 = vst [vmem:[%s137_s30 + $0x8] sm:$0xff] %v161_v1   ;;  %v181_v6 = vld [vmem:[%s1148_s29 + $0x50] sm:$0xff]   ;;  %v185_v7 = vld [vmem:[%s1148_s29 + $0x58] sm:$0xff]   ;;  %v189_v8 = vld [vmem:[%s1148_s29 + $0x80] sm:$0xff]  }
  0x17   : > { %166 = vst [vmem:[%s137_s30 + $0x10] sm:$0xff] %v165_v2   ;;  %v193_v9 = vld [vmem:[%s1148_s29 + $0x88] sm:$0xff]   ;;  %v197_v10 = vld [vmem:[%s1148_s29 + $0x90] sm:$0xff]   ;;  %v201_v11 = vld [vmem:[%s1148_s29 + $0x98] sm:$0xff]  }
  0x18   : > { %170 = vst [vmem:[%s137_s30 + $0x18] sm:$0xff] %v169_v3   ;;  %v205_v12 = vld [vmem:[%s1148_s29 + $0xc0] sm:$0xff]   ;;  %v209_v13 = vld [vmem:[%s1148_s29 + $0xc8] sm:$0xff]   ;;  %v213_v14 = vld [vmem:[%s1148_s29 + $0xd0] sm:$0xff]  }
  0x19   : > { %174 = vst [vmem:[%s137_s30 + $0x20] sm:$0xff] %v173_v4   ;;  %v217_v15 = vld [vmem:[%s1148_s29 + $0xd8] sm:$0xff]  }
  0x1a   : > { %178 = vst [vmem:[%s137_s30 + $0x28] sm:$0xff] %v177_v5  }
  0x1b   : > { %182 = vst [vmem:[%s137_s30 + $0x30] sm:$0xff] %v181_v6  }
  0x1c   : > { %186 = vst [vmem:[%s137_s30 + $0x38] sm:$0xff] %v185_v7  }
  0x1d   : > { %190 = vst [vmem:[%s137_s30 + $0x40] sm:$0xff] %v189_v8  }
  0x1e   : > { %194 = vst [vmem:[%s137_s30 + $0x48] sm:$0xff] %v193_v9  }
  0x1f   : > { %198 = vst [vmem:[%s137_s30 + $0x50] sm:$0xff] %v197_v10  }
  0x20   : > { %202 = vst [vmem:[%s137_s30 + $0x58] sm:$0xff] %v201_v11  }
  0x21   : > { %206 = vst [vmem:[%s137_s30 + $0x60] sm:$0xff] %v205_v12  }
  0x22   : > { %210 = vst [vmem:[%s137_s30 + $0x68] sm:$0xff] %v209_v13  }
  0x23   : > { %214 = vst [vmem:[%s137_s30 + $0x70] sm:$0xff] %v213_v14  }
  0x24   : > { %218 = vst [vmem:[%s137_s30 + $0x78] sm:$0xff] %v217_v15  }
  0x25 PF: > { %p809_p10 = scmp.ge.s32.totalorder %s1069_s15, 1  ;;  %p307_p11 = scmp.lt.s32.totalorder %s1069_s15, 3 }
  0x27   : > { %p308_p12 = pnand %p809_p10, %p307_p11 }
  0x28   : > { %s1181_s17 = sand.u32 (!%p308_p12), 1, %s1061_s13   ;;  %s963_s5 = sshll.u32 (!%p308_p12), %s802_s16, 6 }
  0x29   : > { %311 = sbr.rel (%p308_p12) target bundleno = 272 (0x110), region = 69  ;;  %s810_s24 = sshll.u32 (!%p308_p12), %s1181_s17, 7 }
  0x2a   : > { %s1190_s27 = scalar_lea.vmem (!%p308_p12), [#allocation2], %s810_s24  ;;  %s811_s30 = sshll.u32 (!%p308_p12), %s1181_s17, 6 }
  0x2b   : > { %s1231_s4 = scalar_lea.vmem (!%p308_p12), [#allocation3], %s811_s30  ;;  %s731_s8 = scalar_lea.hbm (!%p308_p12), %s1294_s3, %s963_s5 }
  0x2c   : > { %s732_s9 = sshll.u32 (!%p308_p12), %s1231_s4, 4  ;;  %s734_s10 = sshll.u32 (!%p308_p12), %s731_s8, 4  ;;  %s733_s9 = int_to_ptr.vmem [resolvable:$true] %s732_s9  ;;  %s735_s10 = int_to_ptr.hbm [resolvable:$true] %s734_s10 }
  0x2d   : > { %s720_s16 = scalar_lea.sflag (!%p308_p12), [#allocation4], %s1181_s17  ;;  %s1021_s11 = sshra.s32 (!%p308_p12), %s735_s10, 4  ;;  %s1022_s11 = int_to_ptr.hbm [resolvable:$true] %s1021_s11 }
  0x2e   : > { %v846_v16 = vld [vmem:[%s1292_s1 + $0x20] sm:$0xf]  ;;  %v946_v17 = vld [vmem:[%s1292_s1 + $0x20] sm:$0x30]  ;;  %vm420_vm0 = vcmask 1044480   ;;  %vm421_vm1 = vcmask 1045504   ;;  %p1028_p2 = scmp.lt.s32.totalorder %s1022_s11, %s1294_s3 }
  0x2f   : > { %v847_v18 = vor.u32 %v946_v17, %v846_v16  ;;  %v1071_v19 = vmov 65535   ;;  %v945_v23 = vld [vmem:[%s1292_s1 + $0x18] sm:$0xff]  ;;  %v944_v24 = vld [vmem:[%s1292_s1 + $0x10] sm:$0xff]  ;;  %v943_v25 = vld [vmem:[%s1292_s1 + $0x8] sm:$0xff]  ;;  %vm407_vm2 = vcmask 613376   ;;  %vm710_vm3 = vcmask 261120  }
  0x30   : > { %v422_v20 = vsel %vm420_vm0, 4294967295, %v1071_v19  ;;  %v942_v26 = vld [vmem:[%s1292_s1] sm:$0xff]  ;;  %v948_v31 = vld [vmem:[%s1190_s27 + $0x8] sm:$0xff]  ;;  %v949_v35 = vld [vmem:[%s1190_s27 + $0x10] sm:$0xff]  ;;  %s1023_s19 = scalar_lea.hbm %s1022_s11, 64  ;;  %s1027_s25 = scalar_lea.hbm %s1294_s3, 128 }
  0x31   : > { %v423_v21 = vsel %vm421_vm1, %v422_v20, 0  ;;  %v947_v27 = vld [vmem:[%s1190_s27] sm:$0xff]  ;;  %v952_v32 = vld [vmem:[%s1190_s27 + $0x28] sm:$0xff]  ;;  %v953_v36 = vld [vmem:[%s1190_s27 + $0x30] sm:$0xff]  ;;  %p1024_p13 = scmp.ne.s32.totalorder %s1022_s11, %s1023_s19  ;;  %p1029_p3 = scmp.lt.s32.totalorder %s1027_s25, %s1023_s19 }
  0x32   : > { %v425_v22 = vand.u32 %v847_v18, %v423_v21  ;;  %v951_v28 = vld [vmem:[%s1190_s27 + $0x20] sm:$0xff]  ;;  %v956_v33 = vld [vmem:[%s1190_s27 + $0x48] sm:$0xff]  ;;  %v957_v37 = vld [vmem:[%s1190_s27 + $0x50] sm:$0xff] }
  0x33   : > { %v955_v29 = vld [vmem:[%s1190_s27 + $0x40] sm:$0xff]  ;;  %v960_v34 = vld [vmem:[%s1190_s27 + $0x68] sm:$0xff]  ;;  %v961_v38 = vld [vmem:[%s1190_s27 + $0x70] sm:$0xff]  ;;  %p1025_p0 = pnand %p1024_p13, %p1132_p6  ;;  %p1030_p4 = por %p1029_p3, %p1028_p2 }
  0x34   : > { %430 = vmatpush.bf16.msra.mxu0 %v425_v22  ;;  %500 = vmatpush.bf16.msra.mxu1 %v425_v22  ;;  %v959_v30 = vld [vmem:[%s1190_s27 + $0x60] sm:$0xff]  ;;  %v950_v39 = vld [vmem:[%s1190_s27 + $0x18] sm:$0xff] }
  0x35   : > { %578 = vmatpush.bf16.msra.mxu2 %v425_v22  ;;  %656 = vmatpush.bf16.msra.mxu3 %v425_v22  ;;  %v954_v40 = vld [vmem:[%s1190_s27 + $0x38] sm:$0xff]  ;;  %v1227_v49 = vld [vmem:[%s1293_s2] ss:$0 sm:$0xff]  ;;  %p1026_p1 = pneg %p1025_p0 }
  0x36   : > { %v958_v41 = vld [vmem:[%s1190_s27 + $0x58] sm:$0xff] }
  0x37   : > { %v962_v42 = vld [vmem:[%s1190_s27 + $0x78] sm:$0xff]  ;;  %p1031_p5 = pnand %p1030_p4, %p1026_p1 }
  0x38   : > { %431 = vmatpush.bf16.msra.mxu0 %v945_v23  ;;  %501 = vmatpush.bf16.msra.mxu1 %v945_v23 }
  0x39   : > { %579 = vmatpush.bf16.msra.mxu2 %v945_v23  ;;  %657 = vmatpush.bf16.msra.mxu3 %v945_v23 }
  0x3c   : > { %432 = vmatpush.bf16.msra.mxu0 %v944_v24  ;;  %502 = vmatpush.bf16.msra.mxu1 %v944_v24 }
  0x3d   : > { %580 = vmatpush.bf16.msra.mxu2 %v944_v24  ;;  %658 = vmatpush.bf16.msra.mxu3 %v944_v24 }
  0x40   : > { %433 = vmatpush.bf16.msra.mxu0 %v943_v25  ;;  %503 = vmatpush.bf16.msra.mxu1 %v943_v25 }
  0x41   : > { %581 = vmatpush.bf16.msra.mxu2 %v943_v25  ;;  %659 = vmatpush.bf16.msra.mxu3 %v943_v25 }
  0x44   : > { %434 = vmatpush.bf16.msra.mxu0 %v942_v26  ;;  %504 = vmatpush.bf16.msra.mxu1 %v942_v26 }
  0x45   : > { %582 = vmatpush.bf16.msra.mxu2 %v942_v26  ;;  %660 = vmatpush.bf16.msra.mxu3 %v942_v26 }
  0x47   : > { %848 = vmatmul.msk.bf16.vlgmr.msra.gmra.mxu0 %vm407_vm2, %v947_v27  ;;  %876 = vmatmul.msk.bf16.vlgmr.msra.gmra.mxu1 %vm407_vm2, %v951_v28 }
  0x48   : > { %904 = vmatmul.msk.bf16.vlgmr.msra.gmra.mxu2 %vm407_vm2, %v955_v29  ;;  %932 = vmatmul.msk.bf16.vlgmr.msra.gmra.mxu3 %vm407_vm2, %v959_v30 }
  0x57   : > { %849 = vmatmul.msk.bf16.gmra.mxu0 %vm407_vm2, %v948_v31  ;;  %877 = vmatmul.msk.bf16.gmra.mxu1 %vm407_vm2, %v952_v32 }
  0x58   : > { %905 = vmatmul.msk.bf16.gmra.mxu2 %vm407_vm2, %v956_v33  ;;  %933 = vmatmul.msk.bf16.gmra.mxu3 %vm407_vm2, %v960_v34 }
  0x67   : > { %850 = vmatmul.msk.bf16.gmra.mxu0 %vm407_vm2, %v949_v35  ;;  %878 = vmatmul.msk.bf16.gmra.mxu1 %vm407_vm2, %v953_v36 }
  0x68   : > { %906 = vmatmul.msk.bf16.gmra.mxu2 %vm407_vm2, %v957_v37  ;;  %934 = vmatmul.msk.bf16.gmra.mxu3 %vm407_vm2, %v961_v38 }
  0x77   : > { %851 = vmatmul.msk.bf16.gmra.mxu0 %vm407_vm2, %v950_v39  ;;  %879 = vmatmul.msk.bf16.gmra.mxu1 %vm407_vm2, %v954_v40 }
  0x78   : > { %907 = vmatmul.msk.bf16.gmra.mxu2 %vm407_vm2, %v958_v41  ;;  %935 = vmatmul.msk.bf16.gmra.mxu3 %vm407_vm2, %v962_v42 }
  0xc4   : > { %v436_v43 = vpop.f32.mrf.mxu0  ;;  %v506_v44 = vpop.f32.mrf.mxu1 }
  0xc5   : > { %v526_v45 = vmax.f32 %v436_v43, %v506_v44 }
  0xcb   : > { %v584_v46 = vpop.f32.mrf.mxu2  ;;  %v662_v47 = vpop.f32.mrf.mxu3 }
  0xcc   : > { %v604_v48 = vmax.f32 %v526_v45, %v584_v46  ;;  %v438_v50 = vpop.f32.mrf.mxu0  ;;  %v508_v51 = vpop.f32.mrf.mxu1 }
  0xcd   : > { %v527_v55 = vmax.f32 %v438_v50, %v508_v51 }
  0xce   : > { %v682_v52 = vmax.f32 %v604_v48, %v662_v47 }
  0xd0   : > { %v694_v53 = vadd.f32 %v1227_v49, %v682_v52 }
  0xd2   : > { %v702_v54 = vmax.f32 %v694_v53, 0.0 }
  0xd3   : > { %v586_v56 = vpop.f32.mrf.mxu2  ;;  %v664_v57 = vpop.f32.mrf.mxu3 }
  0xd4   : > { %711 = vst.msk [vmem:[%s1231_s4] sm:$0xff] %vm710_vm3, %v702_v54  ;;  %v605_v58 = vmax.f32 %v527_v55, %v586_v56  ;;  %v441_v59 = vpop.f32.mrf.mxu0  ;;  %v511_v60 = vpop.f32.mrf.mxu1 }
  0xd5   : > { %v528_v63 = vmax.f32 %v441_v59, %v511_v60 }
  0xd6   : > { %v683_v61 = vmax.f32 %v605_v58, %v664_v57 }
  0xd8   : > { %v695_v62 = vadd.f32 %v1227_v49, %v683_v61 }
  0xda   : > { %v703_v0 = vmax.f32 %v695_v62, 0.0 }
  0xdb   : > { %v589_v1 = vpop.f32.mrf.mxu2  ;;  %v667_v2 = vpop.f32.mrf.mxu3 }
  0xdc   : > { %712 = vst.msk [vmem:[%s1231_s4 + $0x8] sm:$0xff] %vm710_vm3, %v703_v0  ;;  %v606_v3 = vmax.f32 %v528_v63, %v589_v1  ;;  %v443_v4 = vpop.f32.mrf.mxu0  ;;  %v513_v5 = vpop.f32.mrf.mxu1 }
  0xdd   : > { %v529_v9 = vmax.f32 %v443_v4, %v513_v5 }
  0xde   : > { %v684_v6 = vmax.f32 %v606_v3, %v667_v2 }
  0xe0   : > { %v696_v7 = vadd.f32 %v1227_v49, %v684_v6 }
  0xe2   : > { %v704_v8 = vmax.f32 %v696_v7, 0.0 }
  0xe3   : > { %v591_v10 = vpop.f32.mrf.mxu2  ;;  %v669_v11 = vpop.f32.mrf.mxu3 }
  0xe4   : > { %713 = vst.msk [vmem:[%s1231_s4 + $0x10] sm:$0xff] %vm710_vm3, %v704_v8  ;;  %v607_v12 = vmax.f32 %v529_v9, %v591_v10  ;;  %v446_v13 = vpop.f32.mrf.mxu0  ;;  %v516_v14 = vpop.f32.mrf.mxu1 }
  0xe5   : > { %v530_v17 = vmax.f32 %v446_v13, %v516_v14 }
  0xe6   : > { %v685_v15 = vmax.f32 %v607_v12, %v669_v11 }
  0xe8   : > { %v697_v16 = vadd.f32 %v1227_v49, %v685_v15 }
  0xea   : > { %v705_v18 = vmax.f32 %v697_v16, 0.0 }
  0xeb   : > { %v594_v19 = vpop.f32.mrf.mxu2  ;;  %v672_v20 = vpop.f32.mrf.mxu3 }
  0xec   : > { %714 = vst.msk [vmem:[%s1231_s4 + $0x18] sm:$0xff] %vm710_vm3, %v705_v18  ;;  %v608_v21 = vmax.f32 %v530_v17, %v594_v19  ;;  %v448_v22 = vpop.f32.mrf.mxu0  ;;  %v518_v23 = vpop.f32.mrf.mxu1 }
  0xed   : > { %v531_v27 = vmax.f32 %v448_v22, %v518_v23 }
  0xee   : > { %v686_v24 = vmax.f32 %v608_v21, %v672_v20 }
  0xf0   : > { %v698_v25 = vadd.f32 %v1227_v49, %v686_v24 }
  0xf2   : > { %v706_v26 = vmax.f32 %v698_v25, 0.0 }
  0xf3   : > { %v596_v28 = vpop.f32.mrf.mxu2  ;;  %v674_v29 = vpop.f32.mrf.mxu3 }
  0xf4   : > { %715 = vst.msk [vmem:[%s1231_s4 + $0x20] sm:$0xff] %vm710_vm3, %v706_v26  ;;  %v609_v30 = vmax.f32 %v531_v27, %v596_v28  ;;  %v451_v31 = vpop.f32.mrf.mxu0  ;;  %v521_v32 = vpop.f32.mrf.mxu1 }
  0xf5   : > { %v532_v35 = vmax.f32 %v451_v31, %v521_v32 }
  0xf6   : > { %v687_v33 = vmax.f32 %v609_v30, %v674_v29 }
  0xf8   : > { %v699_v34 = vadd.f32 %v1227_v49, %v687_v33 }
  0xfa   : > { %v707_v36 = vmax.f32 %v699_v34, 0.0 }
  0xfb   : > { %v599_v37 = vpop.f32.mrf.mxu2  ;;  %v677_v38 = vpop.f32.mrf.mxu3 }
  0xfc   : > { %716 = vst.msk [vmem:[%s1231_s4 + $0x28] sm:$0xff] %vm710_vm3, %v707_v36  ;;  %v610_v39 = vmax.f32 %v532_v35, %v599_v37  ;;  %v453_v41 = vpop.f32.mrf.mxu0  ;;  %v523_v42 = vpop.f32.mrf.mxu1 }
  0xfd   : > { %v533_v45 = vmax.f32 %v453_v41, %v523_v42 }
  0xfe   : > { %v688_v40 = vmax.f32 %v610_v39, %v677_v38 }
 0x100   : > { %v700_v43 = vadd.f32 %v1227_v49, %v688_v40 }
 0x102   : > { %v708_v44 = vmax.f32 %v700_v43, 0.0 }
 0x103   : > { %v601_v46 = vpop.f32.mrf.mxu2  ;;  %v679_v48 = vpop.f32.mrf.mxu3 }
 0x104   : > { %717 = vst.msk [vmem:[%s1231_s4 + $0x30] sm:$0xff] %vm710_vm3, %v708_v44  ;;  %v611_v47 = vmax.f32 %v533_v45, %v601_v46 }
 0x106   : > { %v689_v50 = vmax.f32 %v611_v47, %v679_v48 }
 0x108   : > { %v701_v51 = vadd.f32 %v1227_v49, %v689_v50 }
 0x10a   : > { %v709_v52 = vmax.f32 %v701_v51, 0.0 }
 0x10c   : > { %718 = vst.msk [vmem:[%s1231_s4 + $0x38] sm:$0xff] %vm710_vm3, %v709_v52 }
 0x10d   : > { %1034 = shalt.err (!%p1031_p5)
}
 0x10e   : > { %s1072_s17 = smov 128   ;;  %s1073_s28 = smov 8  }
 0x10f   : > { %964 = dma.vmem_to_hbm [thread:$0]  (%p1132_p6), %s733_s9, 1024, %s735_s10, %s720_s16, %s1072_s17, %s1072_s17, %s1073_s28  }
 0x110 PF: > { %s749_s29 = sand.u32 1, %s1057_s12   ;;  %p967_p7 = pnand %p805_p9, %p1136_p8 }
 0x111   : > { %s750_s30 = scalar_lea.sflag [#allocation4], %s749_s29 }
 0x112   : > { %p968_p10 = pneg %p967_p7 }
 0x114   : > { %1052 = dma.done.wait (%p968_p10), %s750_s30, 1024  }
 0x115   : > { %1054 = vsyncadd (%p968_p10), %s750_s30, 4294966272  ;;  %p13_p11 = scmp.ge.s32.totalorder %s1117_s18, 4   ;;  %s1297_s12 = smov %s1061_s13 }
 0x116   : > { %s1298_s13 = smov %s1065_s14  ;;  %s1299_s14 = smov %s1130_s21 }
 0x117   : > { %s1300_s15 = smov %s1117_s18  ;;  %15 = sbr.rel (!%p13_p11) target bundleno = 3 (0x3), region = 116 }
 0x11c   :  { %756 = vsyncpa [#allocation4], 1 }
 0x11d   :  { %758 = vsyncpa [#allocation4 + $0x1], 1 }

</bundles_post_ra>
